<compile_context>
chip_gen: v7x
topology: tpu7x:2x2x1
jax: 0.10.0
libtpu: 0.0.40
codegen_flags: <defaults>
</compile_context>

<pallas_src>
import numpy as np
import jax
import jax.numpy as jnp
from jax.experimental import pallas as pl
from jax.experimental.pallas import tpu as pltpu


# ----------------------------------------------------------------------------
# helpers
# ----------------------------------------------------------------------------
def _round_up(x, m):
    return ((x + m - 1) // m) * m


def _round_down(x, m):
    return (x // m) * m


def _pad_to(a, shape):
    pads = [(0, s - d) for d, s in zip(a.shape, shape)]
    if all(p == (0, 0) for p in pads):
        return a
    return jnp.pad(a, pads)


# ----------------------------------------------------------------------------
# Tiled matmul + bias kernel (linear transforms, weights pre-prepped at init)
# ----------------------------------------------------------------------------
def _matmul_bias_kernel(x_ref, w_ref, b_ref, o_ref, acc_ref):
    k = pl.program_id(2)

    @pl.when(k == 0)
    def _init():
        acc_ref[...] = jnp.zeros_like(acc_ref)

    # w is pre-transposed (in, out) at init -> no in-kernel transpose.
    # bf16 x bf16 operands, f32 accumulation on the MXU.
    acc_ref[...] += jnp.dot(x_ref[...], w_ref[...],
                            preferred_element_type=jnp.float32)

    @pl.when(k == pl.num_programs(2) - 1)
    def _finalize():
        o_ref[...] = (acc_ref[...] + b_ref[...]).astype(o_ref.dtype)


def matmul_bias_pallas(x, w_p, b_p, *, n_out, tn, tk, tm_max=512,
                       vmem_limit_bytes=48 * 1024 * 1024):
    """(x @ w_p + b_p)[:, :n_out].

    x:   (M, K) activations (cast to the weight dtype for streaming).
    w_p: (Kp, Np) pre-transposed, pre-padded weight (typically bf16).
    b_p: (1, Np) f32 bias, pre-padded.
    tn/tk chosen once at init; tm chosen here from the batch size so the M
    grid stays at 1 whenever the x slab fits a modest VMEM budget.
    """
    M, K = x.shape
    Kp, Np = w_p.shape
    itemsize = w_p.dtype.itemsize

    # Keep the double-buffered x slab <= ~8 MiB; prefer one M block.
    tm_cap = max(8, _round_down((8 * 1024 * 1024) // (Kp * itemsize), 8))
    tm = min(tm_max, tm_cap, _round_up(M, 8))
    Mp = _round_up(M, tm)

    x_p = _pad_to(x.astype(w_p.dtype), (Mp, Kp))

    grid = (Mp // tm, Np // tn, Kp // tk)
    out = pl.pallas_call(
        _matmul_bias_kernel,
        out_shape=jax.ShapeDtypeStruct((Mp, Np), jnp.float32),
        grid=grid,
        in_specs=[
            pl.BlockSpec((tm, tk), lambda i, j, k: (i, k)),
            pl.BlockSpec((tk, tn), lambda i, j, k: (k, j)),
            pl.BlockSpec((1, tn), lambda i, j, k: (0, j)),
        ],
        out_specs=pl.BlockSpec((tm, tn), lambda i, j, k: (i, j)),
        scratch_shapes=[pltpu.VMEM((tm, tn), jnp.float32)],
        compiler_params=pltpu.CompilerParams(
            dimension_semantics=("parallel", "parallel", "arbitrary"),
            vmem_limit_bytes=vmem_limit_bytes),
    )(x_p, w_p, b_p)
    return out[:M, :n_out]


# ----------------------------------------------------------------------------
# Fused MLP kernel: (Linear+ReLU) * fc_num then Linear + Sigmoid
# ----------------------------------------------------------------------------
def _make_mlp_kernel(n_layers):
    def kernel(*refs):
        x_ref = refs[0]
        o_ref = refs[-1]
        wb = refs[1:-1]
        h = x_ref[...]
        for i in range(n_layers):
            w = wb[2 * i][...]        # (Din_pad, Dout_pad), pre-transposed
            b = wb[2 * i + 1][...]    # (1, Dout_pad)
            h = jnp.dot(h, w, preferred_element_type=jnp.float32) + b
            if i < n_layers - 1:
                h = jnp.maximum(h, 0.0)                 # ReLU (VPU)
            else:
                h = 1.0 / (1.0 + jnp.exp(-h))           # exact f32 sigmoid
        o_ref[...] = h
    return kernel


def _const_spec(shape, single_buffer):
    # Block index never changes -> single-buffer to avoid 2x resident weight
    # bytes in VMEM (matters for larger hidden sizes, esp. v7x's 64 MiB VMEM).
    if single_buffer:
        return pl.BlockSpec(shape, lambda i: (0, 0), pipeline_mode=pl.Buffered(1))
    return pl.BlockSpec(shape, lambda i: (0, 0))


def _mlp_pallas(x, w_ps, b_ps, out_dim, *, row_tile, single_buffer_weights,
                vmem_limit_bytes=32 * 1024 * 1024):
    M, _ = x.shape
    Din_p = w_ps[0].shape[0]
    Dout_p = w_ps[-1].shape[1]

    tm = min(row_tile, _round_up(M, 8))
    Mp = _round_up(M, tm)
    x_p = _pad_to(x.astype(jnp.float32), (Mp, Din_p))

    args = [x_p]
    in_specs = [pl.BlockSpec((tm, Din_p), lambda i: (i, 0))]
    for w_p, b_p in zip(w_ps, b_ps):
        args += [w_p, b_p]
        in_specs += [_const_spec(tuple(w_p.shape), single_buffer_weights),
                     _const_spec(tuple(b_p.shape), single_buffer_weights)]

    out = pl.pallas_call(
        _make_mlp_kernel(len(w_ps)),
        out_shape=jax.ShapeDtypeStruct((Mp, Dout_p), jnp.float32),
        grid=(Mp // tm,),
        in_specs=in_specs,
        out_specs=pl.BlockSpec((tm, Dout_p), lambda i: (i, 0)),
        compiler_params=pltpu.CompilerParams(
            dimension_semantics=("parallel",),
            vmem_limit_bytes=vmem_limit_bytes),
    )(*args)
    return out[:M, :out_dim]


def mlp_pallas(x, fc_prep, *, row_tile=256):
    """fc_prep: dict with pre-transposed / pre-padded f32 weights from init."""
    try:
        return _mlp_pallas(x, fc_prep["w"], fc_prep["b"], fc_prep["out_dim"],
                           row_tile=row_tile, single_buffer_weights=True)
    except Exception:
        # pipeline_mode=pl.Buffered(1) unsupported on this jax build; the
        # double-buffered path is identical numerically (just uses more VMEM).
        return _mlp_pallas(x, fc_prep["w"], fc_prep["b"], fc_prep["out_dim"],
                           row_tile=row_tile, single_buffer_weights=False)


# ----------------------------------------------------------------------------
# Parameter init + one-time weight prep (hoisted off the forward hot path)
# ----------------------------------------------------------------------------
def init_params(key, qbits_num, output_size, input_channels=2, fc_num=4,
                linear_transforms=1, hidden_size=128,
                lt_weight_dtype=jnp.bfloat16):
    dim = 2 ** qbits_num
    d2 = dim * dim

    def _linear(k, fan_in, fan_out):
        kw, kb = jax.random.split(k)
        bound = 1.0 / np.sqrt(fan_in)
        w = jax.random.uniform(kw, (fan_out, fan_in), jnp.float32, -bound, bound)
        b = jax.random.uniform(kb, (fan_out,), jnp.float32, -bound, bound)
        return w, b

    keys = jax.random.split(key, linear_transforms + fc_num + 1)
    lt = [_linear(keys[i], d2, d2) for i in range(linear_transforms)]

    fc = []
    k_idx = linear_transforms
    fc.append(_linear(keys[k_idx], dim * (linear_transforms + 1), hidden_size))
    for i in range(fc_num - 1):
        fc.append(_linear(keys[k_idx + 1 + i], hidden_size, hidden_size))
    fc.append(_linear(keys[k_idx + fc_num], hidden_size, output_size))

    # ---- linear transforms: ONE concatenated (in, out) matmul weight --------
    K = d2
    N = linear_transforms * d2
    w_cat = jnp.concatenate([w.T for (w, _) in lt], axis=1)      # (K, N) f32
    b_cat = jnp.concatenate([b for (_, b) in lt], axis=0)        # (N,)  f32

    use_pallas_lt = d2 >= 128   # below a lane width, padded tiles stream up to
                                # 64x extra weight bytes -> plain XLA is better.
    if use_pallas_lt:
        Kp = _round_up(K, 128)
        tk = Kp                                    # full-K reduction: 1 K step
        w_itemsize = np.dtype(lt_weight_dtype).itemsize
        # ~8 MiB weight block (16 MiB double-buffered): safe on v7x's 64 MiB
        # VMEM, big enough for ~85%+ of HBM roofline on v5e/v6e.
        tn = max(128, _round_down((8 * 1024 * 1024) // (tk * w_itemsize), 128))
        Np0 = _round_up(N, 128)
        tn = min(tn, Np0)
        if Np0 >= 256 and tn >= Np0:
            tn = _round_up(Np0 // 2, 128)          # keep >=2 N blocks (megacore)
        Np = _round_up(Np0, tn)
        # TODO(synk): on v7x, fp8 weight storage would cut HBM bytes 4x more;
        # needs end-to-end accuracy validation before adopting.
        lt_prep = dict(
            use_pallas=True, K=K, N=N, tk=tk, tn=tn,
            w=_pad_to(w_cat, (Kp, Np)).astype(lt_weight_dtype),   # bf16 stream
            b=_pad_to(b_cat.reshape(1, N), (1, Np)).astype(jnp.float32))
    else:
        lt_prep = dict(use_pallas=False, K=K, N=N,
                       w=w_cat.astype(jnp.float32), b=b_cat)

    # ---- fc stack: pre-transpose + pad every feature dim to 128 lanes -------
    dims = [dim * (linear_transforms + 1)] + [w.shape[0] for (w, _) in fc]
    dims_p = [_round_up(d, 128) for d in dims]
    fc_w = [_pad_to(w.T.astype(jnp.float32), (dims_p[i], dims_p[i + 1]))
            for i, (w, _) in enumerate(fc)]
    fc_b = [_pad_to(b.astype(jnp.float32).reshape(1, -1), (1, dims_p[i + 1]))
            for i, (_, b) in enumerate(fc)]
    fc_prep = dict(w=fc_w, b=fc_b, out_dim=output_size)

    cfg = dict(dim=dim, input_channels=input_channels,
               linear_transforms=linear_transforms)
    return {"lt": lt_prep, "fc": fc_prep, "cfg": cfg}


# ----------------------------------------------------------------------------
# Forward pass
# ----------------------------------------------------------------------------
def eigvals_classifier_forward(x, params, *, eig_host_chunk=64):
    cfg = params["cfg"]
    dim = cfg["dim"]
    C = cfg["input_channels"]
    L = cfg["linear_transforms"]
    d2 = dim * dim
    B = x.shape[0]

    # --- all linear transforms as ONE tiled Pallas matmul -------------------
    x_flat = x.reshape(B * C, d2)                         # rows: b0c0,b0c1,b1c0,...
    lt = params["lt"]
    if lt["use_pallas"]:
        y = matmul_bias_pallas(x_flat, lt["w"], lt["b"],
                               n_out=lt["N"], tn=lt["tn"], tk=lt["tk"])
    else:
        y = x_flat @ lt["w"] + lt["b"]                    # d2 < 128: XLA is better
    x_transform = y.reshape(B, C, L, d2).transpose(0, 2, 1, 3)    # (B, L, C, d2)

    # --- build complex matrices ----------------------------------------------
    x_t_complex = (x_transform[:, :, 0] + 1j * x_transform[:, :, 1]).reshape(
        B, L, dim, dim)
    x_complex = (x[:, 0] + 1j * x[:, 1])[:, None]          # (B, 1, dim, dim)
    x_cat = jnp.concatenate([x_complex, x_t_complex], axis=1).astype(jnp.complex64)

    # --- eigenvalues ----------------------------------------------------------
    # TODO(synk): torch.linalg.eigvals (general complex eigendecomposition) has
    # no Pallas/TPU equivalent; evaluated on host via jax.pure_callback.
    # Chunking bounds the host working set and lets transfers of chunk i+1
    # start while LAPACK runs on chunk i; full overlap with device compute
    # would require async dispatch.  Eigenvalue order is LAPACK-defined
    # (unsorted), matching torch.linalg.eigvals by convention.
    def _host_eigvals_real(m):
        ev = np.linalg.eigvals(np.asarray(m))              # (..., dim) complex
        return np.ascontiguousarray(ev.real).astype(np.float32)

    chunks = []
    for s in range(0, B, eig_host_chunk):
        part = x_cat[s:s + eig_host_chunk]
        chunks.append(jax.pure_callback(
            _host_eigvals_real,
            jax.ShapeDtypeStruct(part.shape[:-1], jnp.float32),
            part))
    eig_real = chunks[0] if len(chunks) == 1 else jnp.concatenate(chunks, axis=0)
    eig_real = eig_real.reshape(B, (L + 1) * dim)

    # --- fc layers (fused Pallas MLP) ----------------------------------------
    return mlp_pallas(eig_real, params["fc"])


# ----------------------------------------------------------------------------
if __name__ == "__main__":
    # qbits_num=4 -> dim=16, d2=256 (>=128, so the Pallas matmul path runs);
    # batch=2, hidden=32, output=2, one linear transform.
    qbits_num = 4
    output_size = 2
    hidden_size = 32
    fc_num = 4
    linear_transforms = 1
    B = 2
    dim = 2 ** qbits_num

    key = jax.random.PRNGKey(0)
    k_param, k_x = jax.random.split(key)

    params = init_params(k_param, qbits_num, output_size,
                         input_channels=2, fc_num=fc_num,
                         linear_transforms=linear_transforms,
                         hidden_size=hidden_size)

    x = jax.random.normal(k_x, (B, 2, dim, dim), dtype=jnp.float32)

    out = eigvals_classifier_forward(x, params)
    out = jax.block_until_ready(out)
    assert out.shape == (B, output_size)
    assert bool(jnp.all(jnp.isfinite(out)))
    assert bool(jnp.all((out >= 0.0) & (out <= 1.0)))  # sigmoid range
    print("KERNEL_OK")
</pallas_src>

<mosaic_0001>
module attributes {stable_mosaic.version = 11 : i64} {
  func.func @_matmul_bias_kernel(%arg0: i32, %arg1: i32, %arg2: i32, %arg3: memref<8x256xbf16, #tpu.memory_space<vmem>>, %arg4: memref<256x128xbf16, #tpu.memory_space<vmem>>, %arg5: memref<1x128xf32, #tpu.memory_space<vmem>>, %arg6: memref<8x128xf32, #tpu.memory_space<vmem>>, %arg7: memref<8x128xf32, #tpu.memory_space<vmem>>) attributes {dimension_semantics = [#tpu.dimension_semantics<parallel>, #tpu.dimension_semantics<parallel>, #tpu.dimension_semantics<arbitrary>], iteration_bounds = array<i64: 1, 2, 1>, scalar_prefetch = 0 : i64, scratch_operands = 1 : i64, tpu.core_type = #tpu.core_type<tc>, window_params = [{transform_indices = @transform_0, window_bounds = array<i64: 8, 256>}, {transform_indices = @transform_1, window_bounds = array<i64: 256, 128>}, {transform_indices = @transform_2, window_bounds = array<i64: 1, 128>}, {transform_indices = @transform_3, window_bounds = array<i64: 8, 128>}]} {
    %c0_i32 = arith.constant 0 : i32
    %0 = arith.cmpi eq, %arg2, %c0_i32 : i32
    %1 = arith.extui %0 : i1 to i32
    %c0_i32_0 = arith.constant 0 : i32
    %2 = arith.cmpi ne, %1, %c0_i32_0 : i32
    scf.if %2 {
      %cst_10 = arith.constant 0.000000e+00 : f32
      %12 = vector.broadcast %cst_10 : f32 to vector<8x128xf32>
      %c0_11 = arith.constant 0 : index
      %c0_12 = arith.constant 0 : index
      %13 = vector.load %arg7[%c0_11, %c0_12] : memref<8x128xf32, #tpu.memory_space<vmem>>, vector<8x128xf32>
      tpu.vector_store %arg7[%c0_11, %c0_12], %12 {strides = array<i32>} : memref<8x128xf32, #tpu.memory_space<vmem>>, vector<8x128xf32>,
    } else {
    }
    %c0 = arith.constant 0 : index
    %c0_1 = arith.constant 0 : index
    %3 = vector.load %arg7[%c0, %c0_1] : memref<8x128xf32, #tpu.memory_space<vmem>>, vector<8x128xf32>
    %c0_2 = arith.constant 0 : index
    %c0_3 = arith.constant 0 : index
    %4 = vector.load %arg3[%c0_2, %c0_3] : memref<8x256xbf16, #tpu.memory_space<vmem>>, vector<8x256xbf16>
    %c0_4 = arith.constant 0 : index
    %c0_5 = arith.constant 0 : index
    %5 = vector.load %arg4[%c0_4, %c0_5] : memref<256x128xbf16, #tpu.memory_space<vmem>>, vector<256x128xbf16>
    %cst = arith.constant dense<0.000000e+00> : vector<8x128xf32>
    %6 = tpu.matmul %4, %5, %cst {dimension_numbers = #tpu.dot_dimension_numbers<[1], [0], [0], [1], [0, 0, 1, 1], [], []>} : vector<8x256xbf16>, vector<256x128xbf16>, vector<8x128xf32> -> vector<8x128xf32>
    %7 = arith.addf %3, %6 : vector<8x128xf32>
    %c0_6 = arith.constant 0 : index
    %c0_7 = arith.constant 0 : index
    %8 = vector.load %arg7[%c0_6, %c0_7] : memref<8x128xf32, #tpu.memory_space<vmem>>, vector<8x128xf32>
    tpu.vector_store %arg7[%c0_6, %c0_7], %7 {strides = array<i32>} : memref<8x128xf32, #tpu.memory_space<vmem>>, vector<8x128xf32>,
    %c0_i32_8 = arith.constant 0 : i32
    %9 = arith.cmpi eq, %arg2, %c0_i32_8 : i32
    %10 = arith.extui %9 : i1 to i32
    %c0_i32_9 = arith.constant 0 : i32
    %11 = arith.cmpi ne, %10, %c0_i32_9 : i32
    scf.if %11 {
      %c0_10 = arith.constant 0 : index
      %c0_11 = arith.constant 0 : index
      %12 = vector.load %arg7[%c0_10, %c0_11] : memref<8x128xf32, #tpu.memory_space<vmem>>, vector<8x128xf32>
      %c0_12 = arith.constant 0 : index
      %c0_13 = arith.constant 0 : index
      %13 = vector.load %arg5[%c0_12, %c0_13] : memref<1x128xf32, #tpu.memory_space<vmem>>, vector<1x128xf32>
      %14 = vector.broadcast %13 : vector<1x128xf32> to vector<8x128xf32>
      %15 = arith.addf %12, %14 : vector<8x128xf32>
      %c0_14 = arith.constant 0 : index
      %c0_15 = arith.constant 0 : index
      %16 = vector.load %arg6[%c0_14, %c0_15] : memref<8x128xf32, #tpu.memory_space<vmem>>, vector<8x128xf32>
      tpu.vector_store %arg6[%c0_14, %c0_15], %15 {strides = array<i32>} : memref<8x128xf32, #tpu.memory_space<vmem>>, vector<8x128xf32>,
    } else {
    }
    return
  }
  func.func @transform_0(%arg0: i32, %arg1: i32, %arg2: i32) -> (i32, i32) {
    %c0_i32 = arith.constant 0 : i32
    return %arg0, %arg2 : i32, i32
  }
  func.func @transform_1(%arg0: i32, %arg1: i32, %arg2: i32) -> (i32, i32) {
    %c0_i32 = arith.constant 0 : i32
    return %arg2, %arg1 : i32, i32
  }
  func.func @transform_2(%arg0: i32, %arg1: i32, %arg2: i32) -> (i32, i32) {
    %c0_i32 = arith.constant 0 : i32
    %c0_i32_0 = arith.constant 0 : i32
    return %c0_i32, %arg1 : i32, i32
  }
  func.func @transform_3(%arg0: i32, %arg1: i32, %arg2: i32) -> (i32, i32) {
    %c0_i32 = arith.constant 0 : i32
    return %arg0, %arg1 : i32, i32
  }
}

</mosaic_0001>

<bundles_post_ra>
// kernel: tpu_custom_call.1
= control target key start
LH: loop header
LB: loop body
LE: loop exit
PB: predicated region body
PF: predicated region fallthrough
CT: control target
= control target key end

     0   :  { %8 = vsyncpa [#allocation4], 0  ;;  %s1145_s0 = inlined_call_operand.hbm [shape: bf16[8,256], index: 0, kind: input, shape index: {}]   ;;  %s1146_s1 = inlined_call_operand.hbm [shape: bf16[256,256], index: 1, kind: input, shape index: {}]   ;;  %s1147_s2 = inlined_call_operand.vmem [shape: f32[1,256], index: 2, kind: input, shape index: {}]   ;;  %s1148_s3 = inlined_call_operand.hbm [shape: f32[8,256], index: 3, kind: output, shape index: {}]  }
   0x1   :  { %9 = vsyncpa [#allocation7], 0 }
   0x2   :  { %11 = vsyncpa [#allocation7 + $0x1], 0 }
   0x3   :  { %12 = vsyncpa [#allocation5], 0 }
   0x4   :  { %14 = vsyncpa [#allocation5 + $0x1], 0  ;;  %s902_s12 = smov 0   ;;  %s904_s13 = smov 0  }
   0x5   :  { %s906_s14 = smov 0   ;;  %s908_s15 = smov 0  }
   0x6   :  { %s910_s16 = smov 0   ;;  %s912_s17 = smov 0  }
   0x7 LB: > { %s580_s18 = sadd.s32 4294967295, %s874_s17   ;;  %s581_s19 = sadd.s32 4294967294, %s874_s17   ;;  %s874_s17 = sphi %s912_s17, %s20_s17   ;;  %s870_s16 = sphi %s910_s16, %s1176_s16   ;;  %s866_s15 = sphi %s908_s15, %s1175_s15   ;;  %s862_s14 = sphi %s906_s14, %s1174_s14   ;;  %s858_s13 = sphi %s904_s13, %s1173_s13   ;;  %s854_s12 = sphi %s902_s12, %s1172_s12  }
   0x8   : > { %s76_s20 = sadd.s32 1, %s862_s14  ;;  %p83_p0 = scmp.ne.s32.totalorder %s862_s14, %s858_s13 }
   0x9   : > { %p84_p1 = scmp.eq.s32.totalorder %s874_s17, 0  ;;  %p89_p2 = scmp.ne.s32.totalorder %s858_s13, %s854_s12 }
   0xa   : > { %p940_p3 = scmp.eq.s32.totalorder %s580_s18, 0  ;;  %p141_p4 = scmp.eq.s32.totalorder %s580_s18, 1 }
   0xb   : > { %p944_p5 = por %p84_p1, %p83_p0  ;;  %p147_p6 = scmp.eq.s32.totalorder %s581_s19, 1 }
   0xc   : > { %s1155_s21 = scalar_select %p940_p3, 1, 0 }
   0xd   : > { %p950_p7 = por %p940_p3, %p89_p2  ;;  %p954_p8 = por %p141_p4, %p83_p0 }
   0xe   : > { %p958_p9 = por %p147_p6, %p89_p2  ;;  %p582_p10 = scmp.ge.s32.totalorder %s874_s17, 1 }
   0xf   : > { %s1157_s23 = scalar_select %p950_p7, 1, 0 }
  0x10   : > { %s1158_s24 = scalar_select %p954_p8, 1, 0 }
  0x11   : > { %s1159_s25 = scalar_select %p958_p9, 1, 0 }
  0x12   : > { %p154_p11 = scmp.lt.s32.totalorder %s874_s17, 3  ;;  %s876_s27 = smov [#allocation3]  }
  0x13   : > { %s172_s28 = sshll.u32 %s876_s27, 4  ;;  %p657_p1 = scmp.lt.s32.totalorder %s874_s17, 2  ;;  %s173_s28 = int_to_ptr.vmem [resolvable:$true] %s172_s28 }
  0x14   : > { %p965_p13 = pnand %p582_p10, %p154_p11  ;;  %s35_s4 = sadd.s32 1, %s870_s16 }
  0x15   : > { %p974_p4 = pnand %p657_p1, %p944_p5  ;;  %p985_p6 = scmp.ge.s32.totalorder %s35_s4, 2 }
  0x16   : > { %s1160_s26 = scalar_select %p965_p13, 1, 0 }
  0x17   : > { %p644_p0 = pneg %p965_p13  ;;  %s183_s6 = sand.u32 1, %s862_s14  }
  0x18   : > { %s1161_s29 = scalar_select %p974_p4, 1, 0 }
  0x19   : > { %p980_p2 = pnand %p644_p0, %p940_p3  ;;  %s730_s9 = scalar_lea.hbm %s1145_s0, 128 }
  0x1a   : > { %s1163_s5 = scalar_select %p985_p6, 1, 0 }
  0x1b   : > { %p731_p5 = scmp.ne.s32.totalorder %s1145_s0, %s730_s9  ;;  %p732_p10 = pneg %p980_p2 }
  0x1c   : > { %p737_p0 = scmp.lt.u32.totalorder %s730_s9, %s1145_s0 }
  0x1d   : > { %p733_p11 = pnand %p732_p10, %p731_p5 }
  0x1f   : > { %p734_p1 = pneg %p733_p11 }
  0x21   : > { %p739_p12 = pnand %p737_p0, %p734_p1 }
  0x23   : > { %742 = shalt.err (!%p739_p12)
}
  0x24   : > { %s743_s22 = scalar_lea.vmem %s173_s28, 128  ;;  %p751_p3 = scmp.lt.s32.totalorder %s173_s28, %s173_s28 }
  0x25   : > { %p744_p9 = scmp.ne.s32.totalorder %s173_s28, %s743_s22  ;;  %p752_p13 = scmp.lt.s32.totalorder %s743_s22, %s743_s22 }
  0x27   : > { %p746_p8 = pnand %p744_p9, %p732_p10  ;;  %p753_p4 = por %p752_p13, %p751_p3 }
  0x29   : > { %p747_p7 = pneg %p746_p8 }
  0x2b   : > { %p754_p6 = pnand %p753_p4, %p747_p7 }
  0x2d   : > { %757 = shalt.err (!%p754_p6)
}
  0x2e   : > { %647 = dma.hbm_to_vmem [thread:$0]  (!%p980_p2), %s1145_s0, 128, %s173_s28, [#allocation4]  }
  0x2f   : > { %p1164_p9 = scmp.ne.s32.totalorder %s1163_s5, 0  ;;  %s585_s8 = sshll.u32 %s183_s6, 7 }
  0x30   : > { %s586_s10 = sshll.u32 %s870_s16, 6  ;;  %s187_s19 = scalar_lea.vmem [#allocation6], %s585_s8 }
  0x31   : > { %s1178_s4 = smov (%p1164_p9, %s35_s4), 0  ;;  %s1016_s18 = scalar_lea.hbm %s1146_s1, %s586_s10 }
  0x32   : > { %s72_s9 = ssub.s32 %s870_s16, %s1178_s4  ;;  %s196_s22 = sshll.u32 %s187_s19, 4  ;;  %s1023_s22 = int_to_ptr.vmem [resolvable:$true] %s196_s22 }
  0x33   : > { %p74_p3 = scmp.eq.s32.totalorder %s72_s9, 0  ;;  %s1025_s5 = scalar_lea.sflag [#allocation7], %s183_s6 }
  0x34   : > { %s758_s27 = scalar_lea.hbm %s1016_s18, 2048  ;;  %p1165_p8 = scmp.ne.s32.totalorder %s1161_s29, 0 }
  0x35   : > { %s1021_s28 = scalar_select %p74_p3, %s862_s14, %s76_s20  }
  0x36   : > { %p759_p7 = scmp.ne.s32.totalorder %s1016_s18, %s758_s27  ;;  %p760_p12 = pneg %p1165_p8 }
  0x37   : > { %s763_s8 = scalar_lea.hbm %s1146_s1, 4096  ;;  %p764_p2 = scmp.lt.u32.totalorder %s1016_s18, %s1146_s1 }
  0x38   : > { %p761_p13 = pnand %p760_p12, %p759_p7  ;;  %p765_p6 = scmp.lt.u32.totalorder %s763_s8, %s758_s27 }
  0x39   : > { %p767_p10 = scmp.lt.u32.totalorder %s758_s27, %s1016_s18 }
  0x3a   : > { %p762_p4 = pneg %p761_p13  ;;  %p766_p5 = por %p765_p6, %p764_p2 }
  0x3c   : > { %p768_p11 = por %p767_p10, %p766_p5 }
  0x3e   : > { %p769_p1 = pnand %p768_p11, %p762_p4 }
  0x40   : > { %772 = shalt.err (!%p769_p1)
}
  0x41   : > { %s773_s20 = scalar_lea.vmem %s1023_s22, 2048  ;;  %s877_s6 = smov [#allocation6]  }
  0x42   : > { %p774_p0 = scmp.ne.s32.totalorder %s1023_s22, %s773_s20  ;;  %s778_s11 = sshll.u32 %s877_s6, 4  ;;  %s779_s11 = int_to_ptr.vmem [resolvable:$false] %s778_s11 }
  0x43   : > { %s780_s19 = scalar_lea.vmem %s779_s11, 4096  ;;  %p781_p7 = scmp.lt.s32.totalorder %s1023_s22, %s779_s11 }
  0x44   : > { %p776_p9 = pnand %p774_p0, %p760_p12  ;;  %p782_p13 = scmp.lt.s32.totalorder %s780_s19, %s773_s20 }
  0x46   : > { %p777_p3 = pneg %p776_p9  ;;  %p783_p2 = por %p782_p13, %p781_p7 }
  0x48   : > { %p784_p6 = pnand %p783_p2, %p777_p3 }
  0x4a   : > { %787 = shalt.err (!%p784_p6)
}
  0x4b   : > { %s878_s27 = smov 128   ;;  %s879_s7 = smov 64  }
  0x4c   : > { %s880_s9 = smov 4   ;;  %p1166_p12 = scmp.ne.s32.totalorder %s1160_s26, 0 }
  0x4d   : > { %651 = dma.hbm_to_vmem [thread:$0]  (!%p1165_p8), %s1016_s18, 2048, %s1023_s22, %s1025_s5, %s878_s27, %s879_s7, %s880_s9  }
  0x4e   : > { %214 = sbr.rel (%p1166_p12) target bundleno = 354 (0x162), region = 32  ;;  %p1167_p4 = scmp.ne.s32.totalorder (!%p1166_p12), %s1155_s21, 0 }
  0x55   : > { %841 = dma.done.wait (%p1167_p4), [#allocation4], 128  }
  0x56   : > { %843 = vsyncadd (%p1167_p4), [#allocation4], 4294967168  ;;  %s1060_s8 = sand.u32 1, %s858_s13   ;;  %p1168_p8 = scmp.ne.s32.totalorder %s1157_s23, 0 }
  0x57   : > { %s589_s10 = sshll.u32 %s1060_s8, 7  ;;  %s221_s30 = scalar_lea.sflag [#allocation7], %s1060_s8 }
  0x58   : > { %s1064_s20 = scalar_lea.vmem [#allocation6], %s589_s10 }
  0x59   : > { %845 = dma.done.wait (%p1168_p8), %s221_s30, 2048  }
  0x5a   : > { %847 = vsyncadd (%p1168_p8), %s221_s30, 4294965248  ;;  %v712_v0 = vld [vmem:[%s1064_s20 + $0x40] sm:$0xff]   ;;  %v714_v2 = vld [vmem:[%s1064_s20 + $0x48] sm:$0xff]   ;;  %p252_p5 = scmp.lt.s32.totalorder %s866_s15, 1  ;;  %s590_s23 = sshll.u32 %s1060_s8, 3 }
  0x5b   : > { %v713_v1 = vld [vmem:[%s1064_s20] sm:$0xff]   ;;  %614 = vmatprep.subr.bf16.mxu0 %v712_v0  ;;  %v715_v3 = vld [vmem:[%s1064_s20 + $0x8] sm:$0xff]   ;;  %v716_v4 = vld [vmem:[%s1064_s20 + $0x50] sm:$0xff]   ;;  %s611_s22 = sshll.u32 %s866_s15, 7  ;;  %s249_s5 = scalar_lea.vmem [#allocation8], %s590_s23 }
  0x5c   : > { %615 = vmatpush3.bf16.msra.mxu0 %v713_v1  ;;  %v717_v5 = vld [vmem:[%s1064_s20 + $0x10] sm:$0xff]   ;;  %v718_v6 = vld [vmem:[%s1064_s20 + $0x58] sm:$0xff]   ;;  %v720_v8 = vld [vmem:[%s1064_s20 + $0x60] sm:$0xff]   ;;  %s253_s21 = scalar_select %p252_p5, %s866_s15, 1 }
  0x5d   : > { %616 = vmatprep.subr.bf16.mxu0 %v714_v2  ;;  %v719_v7 = vld [vmem:[%s1064_s20 + $0x18] sm:$0xff]   ;;  %v721_v9 = vld [vmem:[%s1064_s20 + $0x20] sm:$0xff]   ;;  %v722_v10 = vld [vmem:[%s1064_s20 + $0x68] sm:$0xff]   ;;  %s469_s6 = sshll.u32 %s249_s5, 4  ;;  %s1096_s27 = scalar_lea.hbm %s1148_s3, %s611_s22  ;;  %s1098_s6 = int_to_ptr.vmem [resolvable:$true] %s469_s6 }
  0x5e   : > { %v262_v11 = vld [vmem:[#allocation3] sm:$0xff]  ;;  %v723_v13 = vld [vmem:[%s1064_s20 + $0x28] sm:$0xff]   ;;  %v724_v14 = vld [vmem:[%s1064_s20 + $0x70] sm:$0xff]   ;;  %s254_s18 = scalar_lea.vmem %s1147_s2, %s253_s21  ;;  %s454_s7 = scalar_lea.sflag [#allocation5], %s1060_s8 }
  0x5f   : > { %v592_v12 = vcombine.high %v262_v11, %v262_v11  ;;  %v725_v15 = vld [vmem:[%s1064_s20 + $0x30] sm:$0xff]   ;;  %v726_v16 = vld [vmem:[%s1064_s20 + $0x78] sm:$0xff]   ;;  %v591_v18 = vcombine.low %v262_v11, %v262_v11  ;;  %s788_s9 = scalar_lea.vmem %s1098_s6, 128  ;;  %p1169_p11 = scmp.ne.s32.totalorder %s1158_s24, 0 }
  0x60   : > { %617 = vmatpush3.bf16.msra.mxu0 %v715_v3  ;;  %v727_v17 = vld [vmem:[%s1064_s20 + $0x38] sm:$0xff]   ;;  %p789_p10 = scmp.ne.s32.totalorder %s1098_s6, %s788_s9  ;;  %s881_s15 = smov [#allocation8]  }
  0x61   : > { %618 = vmatprep.subr.bf16.mxu0 %v716_v4  ;;  %430 = vmatprep.mubr.bf16.mxu0 %v592_v12  ;;  %v609_v21 = vld [vmem:[%s254_s18] ss:$0 sm:$0xff]  ;;  %s792_s10 = sshll.u32 %s881_s15, 4  ;;  %s793_s10 = int_to_ptr.vmem [resolvable:$false] %s792_s10 }
  0x62   : > { %p790_p1 = pnand %p789_p10, %p1169_p11  ;;  %s794_s30 = scalar_lea.vmem %s793_s10, 256 }
  0x63   : > { %p795_p9 = scmp.lt.s32.totalorder %s1098_s6, %s793_s10  ;;  %p796_p3 = scmp.lt.s32.totalorder %s794_s30, %s788_s9 }
  0x64   : > { %619 = vmatpush3.bf16.msra.mxu0 %v717_v5  ;;  %p791_p0 = pneg %p790_p1 }
  0x65   : > { %620 = vmatprep.subr.bf16.mxu0 %v718_v6  ;;  %p797_p7 = por %p796_p3, %p795_p9 }
  0x67   : > { %p798_p13 = pnand %p797_p7, %p791_p0 }
  0x68   : > { %621 = vmatpush3.bf16.msra.mxu0 %v719_v7 }
  0x69   : > { %622 = vmatprep.subr.bf16.mxu0 %v720_v8 }
  0x6c   : > { %623 = vmatpush3.bf16.msra.mxu0 %v721_v9 }
  0x6d   : > { %624 = vmatprep.subr.bf16.mxu0 %v722_v10 }
  0x70   : > { %625 = vmatpush3.bf16.msra.mxu0 %v723_v13 }
  0x71   : > { %626 = vmatprep.subr.bf16.mxu0 %v724_v14 }
  0x74   : > { %627 = vmatpush3.bf16.msra.mxu0 %v725_v15 }
  0x75   : > { %628 = vmatprep.subr.bf16.mxu0 %v726_v16 }
  0x78   : > { %629 = vmatpush3.bf16.msra.mxu0 %v727_v17 }
  0x7b   : > { %431 = vmatmul.mubr.bf16.vlgmr.msra.gmra.mrb[0].mxu0 %v591_v18 }
 0x14e   : > { %v630_v19 = vpop.f32.mrb[0].mxu0 }
 0x14f   : > { %v631_v20 = vpop.f32.mrb[1].mxu0 }
 0x150   : > { %v632_v22 = vadd.f32 %v631_v20, %v630_v19  ;;  %v633_v23 = vpop.f32.mrb[2].mxu0 }
 0x151   : > { %v634_v24 = vpop.f32.mrb[3].mxu0 }
 0x152   : > { %v451_v25 = vadd.f32 %v632_v22, %v609_v21 }
 0x154   : > { %452 = vst [vmem:[%s249_s5] sm:$0xff] %v451_v25 }
 0x155   : > { %801 = shalt.err (!%p798_p13)
}
 0x156   : > { %s802_s8 = scalar_lea.hbm %s1096_s27, 128  ;;  %s806_s23 = scalar_lea.hbm %s1148_s3, 256 }
 0x157   : > { %p803_p2 = scmp.ne.s32.totalorder %s1096_s27, %s802_s8  ;;  %p807_p4 = scmp.lt.u32.totalorder %s1096_s27, %s1148_s3 }
 0x158   : > { %p808_p8 = scmp.lt.u32.totalorder %s806_s23, %s802_s8  ;;  %p810_p10 = scmp.lt.u32.totalorder %s802_s8, %s1096_s27 }
 0x159   : > { %p804_p6 = pnand %p803_p2, %p1169_p11 }
 0x15a   : > { %p809_p5 = por %p808_p8, %p807_p4 }
 0x15b   : > { %p805_p12 = pneg %p804_p6 }
 0x15c   : > { %p811_p1 = por %p810_p10, %p809_p5 }
 0x15e   : > { %p812_p0 = pnand %p811_p1, %p805_p12 }
 0x160   : > { %815 = shalt.err (!%p812_p0)
}
 0x161   : > { %642 = dma.vmem_to_hbm [thread:$0]  (%p1169_p11), %s1098_s6, 128, %s1096_s27, %s454_s7  }
 0x162 PF: > { %s481_s18 = sand.u32 1, %s854_s12   ;;  %p1170_p9 = scmp.ne.s32.totalorder %s1159_s25, 0 }
 0x163   : > { %p1171_p3 = scmp.ge.s32.totalorder %s874_s17, 2  ;;  %s482_s22 = scalar_lea.sflag [#allocation5], %s481_s18 }
 0x165   : > { %p653_p7 = pnand %p1171_p3, %p1170_p9 }
 0x167   : > { %849 = dma.done.wait (!%p653_p7), %s482_s22, 128  }
 0x168   : > { %851 = vsyncadd (!%p653_p7), %s482_s22, 4294967168  ;;  %s20_s17 = sadd.s32 1, %s874_s17   ;;  %s1172_s12 = smov %s858_s13 }
 0x169   : > { %p17_p13 = scmp.ge.s32.totalorder %s20_s17, 4   ;;  %s1173_s13 = smov %s862_s14 }
 0x16a   : > { %s1174_s14 = smov %s1021_s28  ;;  %s1175_s15 = smov %s870_s16 }
 0x16b   : > { %s1176_s16 = smov %s1178_s4  ;;  %19 = sbr.rel (!%p17_p13) target bundleno = 7 (0x7), region = 94 }
 0x172   :  { %487 = vsyncpa [#allocation4], 1 }
 0x173   :  { %489 = vsyncpa [#allocation4 + $0x1], 1 }
 0x174   :  { %490 = vsyncpa [#allocation7], 1 }
 0x175   :  { %492 = vsyncpa [#allocation7 + $0x1], 1 }
 0x176   :  { %493 = vsyncpa [#allocation5], 1 }
 0x177   :  { %495 = vsyncpa [#allocation5 + $0x1], 1 }

</bundles_post_ra>
